<compile_context>
chip_gen: v5e
topology: v5e:2x2
jax: 0.10.0
libtpu: 0.0.40
codegen_flags: <defaults>
</compile_context>

<pallas_src>
import functools

import jax
import jax.numpy as jnp
from jax.experimental import pallas as pl
from jax.experimental.pallas import tpu as pltpu

_LANES = 128


def _round_up(n, m=_LANES):
    return ((n + m - 1) // m) * m


def _fused_mlp_kernel(*refs, num_layers, batch_norm, eps):
    """Fused (Linear -> [BN] -> ReLU) x num_layers, all resident in VMEM."""
    x_ref = refs[0]
    o_ref = refs[-1]
    param_refs = refs[1:-1]
    per = 3 if batch_norm else 2

    h = x_ref[...].astype(jnp.float32)
    for l in range(num_layers):
        lrefs = param_refs[per * l: per * (l + 1)]
        w_ref = lrefs[0]
        # bf16 operands -> native MXU path, f32 accumulation.
        z = jnp.dot(h.astype(jnp.bfloat16), w_ref[...],
                    preferred_element_type=jnp.float32)
        if batch_norm:
            gamma_ref, beta_ref = lrefs[1], lrefs[2]
            # Linear bias omitted: exactly cancelled by BN mean subtraction.
            inv_m = 1.0 / z.shape[0]
            mean = jnp.sum(z, axis=0, keepdims=True) * inv_m
            var = jnp.maximum(
                jnp.sum(z * z, axis=0, keepdims=True) * inv_m - mean * mean,
                0.0)
            scale = gamma_ref[...] * jax.lax.rsqrt(var + eps)
            shift = beta_ref[...] - mean * scale
            z = z * scale + shift          # single FMA-style pass over (M, N)
        else:
            z = z + lrefs[1][...]          # bias
        h = jnp.maximum(z, 0.0)            # ReLU
    o_ref[...] = h.astype(o_ref.dtype)


def mlp_layer_forward(x, params, *, batch_norm=True, dropout_rates=0.0,
                      eps=1e-5):
    """params: list of (w[in,out], b[out], gamma[out], beta[out]) per layer."""
    # TODO(synk): train-mode Dropout (Bernoulli mask * 1/(1-p)) not implemented;
    # only the dropout_rates <= 0 (identity) path is supported here.
    assert dropout_rates == 0.0

    M, d_in = x.shape
    dims = [d_in] + [w.shape[1] for (w, _, _, _) in params]
    pdims = [_round_up(d) for d in dims]
    L = len(params)

    # Lane-dense, zero-padded input features.
    xp = jnp.zeros((M, pdims[0]), jnp.float32).at[:, :d_in].set(
        x.astype(jnp.float32))

    inputs = [xp]
    in_specs = [pl.BlockSpec((M, pdims[0]), lambda i: (0, 0))]
    for l, (w, b, gamma, beta) in enumerate(params):
        k, n = dims[l], dims[l + 1]
        pk, pn = pdims[l], pdims[l + 1]
        # Weights streamed in bf16, zero-padded to lane-dense tiles.
        wp = jnp.zeros((pk, pn), jnp.bfloat16).at[:k, :n].set(
            w.astype(jnp.bfloat16))
        inputs.append(wp)
        in_specs.append(pl.BlockSpec((pk, pn), lambda i: (0, 0)))
        if batch_norm:
            gp = jnp.ones((1, pn), jnp.float32).at[0, :n].set(gamma)
            bp = jnp.zeros((1, pn), jnp.float32).at[0, :n].set(beta)
            inputs += [gp, bp]
            in_specs += [pl.BlockSpec((1, pn), lambda i: (0, 0)),
                         pl.BlockSpec((1, pn), lambda i: (0, 0))]
        else:
            bb = jnp.zeros((1, pn), jnp.float32).at[0, :n].set(b)
            inputs.append(bb)
            in_specs.append(pl.BlockSpec((1, pn), lambda i: (0, 0)))

    kernel = functools.partial(_fused_mlp_kernel, num_layers=L,
                               batch_norm=batch_norm, eps=eps)
    out_padded = pl.pallas_call(
        kernel,
        out_shape=jax.ShapeDtypeStruct((M, pdims[-1]), jnp.float32),
        grid=(1,),
        in_specs=in_specs,
        out_specs=pl.BlockSpec((M, pdims[-1]), lambda i: (0, 0)),
        compiler_params=pltpu.CompilerParams(
            dimension_semantics=("arbitrary",)),
    )(*inputs)
    return out_padded[:, :dims[-1]]


def init_mlp_params(key, input_dim, hidden_units):
    """Matches MlpUnitLayer._init_weight_: xavier_normal_ weight, zero bias,
    default BatchNorm1d affine (gamma=1, beta=0)."""
    params = []
    dims = [input_dim] + list(hidden_units)
    for i in range(len(hidden_units)):
        key, sub = jax.random.split(key)
        fan_in, fan_out = dims[i], dims[i + 1]
        std = (2.0 / (fan_in + fan_out)) ** 0.5       # xavier_normal, gain=1
        w = jax.random.normal(sub, (fan_in, fan_out), jnp.float32) * std
        b = jnp.zeros((fan_out,), jnp.float32)
        gamma = jnp.ones((fan_out,), jnp.float32)     # BatchNorm1d weight
        beta = jnp.zeros((fan_out,), jnp.float32)     # BatchNorm1d bias
        params.append((w, b, gamma, beta))
    return params


def _reference_f32(x, params, *, eps=1e-5):
    """Pure-JAX, full-f32 PyTorch-semantics reference (train-mode BN)."""
    h = x
    for (w, b, gamma, beta) in params:
        z = h @ w + b
        mean = jnp.mean(z, axis=0, keepdims=True)
        var = jnp.mean((z - mean) ** 2, axis=0, keepdims=True)
        z = (z - mean) * jax.lax.rsqrt(var + eps) * gamma + beta
        h = jnp.maximum(z, 0.0)
    return h


def _reference_bf16(x, params, *, eps=1e-5):
    """Pure-JAX reference mirroring the kernel's numerics (bf16 matmul)."""
    h = x.astype(jnp.float32)
    for (w, b, gamma, beta) in params:
        z = jnp.dot(h.astype(jnp.bfloat16), w.astype(jnp.bfloat16),
                    preferred_element_type=jnp.float32)
        inv_m = 1.0 / z.shape[0]
        mean = jnp.sum(z, axis=0, keepdims=True) * inv_m
        var = jnp.maximum(
            jnp.sum(z * z, axis=0, keepdims=True) * inv_m - mean * mean, 0.0)
        scale = gamma * jax.lax.rsqrt(var + eps)
        shift = beta - mean * scale
        h = jnp.maximum(z * scale + shift, 0.0)
    return h


if __name__ == "__main__":
    key = jax.random.PRNGKey(0)
    batch = 8
    input_dim = 32
    hidden_units = (64, 32)

    k_x, k_p = jax.random.split(key)
    x = jax.random.normal(k_x, (batch, input_dim), jnp.float32)
    params = init_mlp_params(k_p, input_dim, hidden_units)

    out = mlp_layer_forward(x, params, batch_norm=True, dropout_rates=0.0)
    out = jax.block_until_ready(out)
    assert out.shape == (batch, hidden_units[-1])

    # Numeric check vs a reference that mirrors the kernel math (bf16 matmul).
    ref_b = _reference_bf16(x, params)
    assert jnp.allclose(out, ref_b, atol=1e-2, rtol=1e-2), \
        float(jnp.max(jnp.abs(out - ref_b)))
    # Semantic sanity vs the full-f32 PyTorch-math reference (bf16 tolerance).
    ref_f = _reference_f32(x, params)
    assert jnp.allclose(out, ref_f, atol=3e-1, rtol=3e-1), \
        float(jnp.max(jnp.abs(out - ref_f)))

    print("KERNEL_OK")
</pallas_src>

<mosaic_0001>
module attributes {stable_mosaic.version = 11 : i64} {
  func.func @_fused_mlp_kernel(%arg0: i32, %arg1: memref<8x128xf32, #tpu.memory_space<vmem>>, %arg2: memref<128x128xbf16, #tpu.memory_space<vmem>>, %arg3: memref<1x128xf32, #tpu.memory_space<vmem>>, %arg4: memref<1x128xf32, #tpu.memory_space<vmem>>, %arg5: memref<128x128xbf16, #tpu.memory_space<vmem>>, %arg6: memref<1x128xf32, #tpu.memory_space<vmem>>, %arg7: memref<1x128xf32, #tpu.memory_space<vmem>>, %arg8: memref<8x128xf32, #tpu.memory_space<vmem>>) attributes {dimension_semantics = [#tpu.dimension_semantics<arbitrary>], iteration_bounds = array<i64: 1>, scalar_prefetch = 0 : i64, scratch_operands = 0 : i64, tpu.core_type = #tpu.core_type<tc>, window_params = [{pipeline_mode = #tpu.pipeline_mode<synchronous>, transform_indices = @transform_0, window_bounds = array<i64: 8, 128>}, {pipeline_mode = #tpu.pipeline_mode<synchronous>, transform_indices = @transform_1, window_bounds = array<i64: 128, 128>}, {pipeline_mode = #tpu.pipeline_mode<synchronous>, transform_indices = @transform_2, window_bounds = array<i64: 1, 128>}, {pipeline_mode = #tpu.pipeline_mode<synchronous>, transform_indices = @transform_3, window_bounds = array<i64: 1, 128>}, {pipeline_mode = #tpu.pipeline_mode<synchronous>, transform_indices = @transform_4, window_bounds = array<i64: 128, 128>}, {pipeline_mode = #tpu.pipeline_mode<synchronous>, transform_indices = @transform_5, window_bounds = array<i64: 1, 128>}, {pipeline_mode = #tpu.pipeline_mode<synchronous>, transform_indices = @transform_6, window_bounds = array<i64: 1, 128>}, {pipeline_mode = #tpu.pipeline_mode<synchronous>, transform_indices = @transform_7, window_bounds = array<i64: 8, 128>}]} {
    %c0 = arith.constant 0 : index
    %c0_0 = arith.constant 0 : index
    %0 = vector.load %arg1[%c0, %c0_0] : memref<8x128xf32, #tpu.memory_space<vmem>>, vector<8x128xf32>
    %1 = arith.truncf %0 : vector<8x128xf32> to vector<8x128xbf16>
    %c0_1 = arith.constant 0 : index
    %c0_2 = arith.constant 0 : index
    %2 = vector.load %arg2[%c0_1, %c0_2] : memref<128x128xbf16, #tpu.memory_space<vmem>>, vector<128x128xbf16>
    %cst = arith.constant dense<0.000000e+00> : vector<8x128xf32>
    %3 = tpu.matmul %1, %2, %cst {dimension_numbers = #tpu.dot_dimension_numbers<[1], [0], [0], [1], [0, 0, 1, 1], [], []>} : vector<8x128xbf16>, vector<128x128xbf16>, vector<8x128xf32> -> vector<8x128xf32>
    %cst_3 = arith.constant dense<0.000000e+00> : vector<128xf32>
    %4 = vector.multi_reduction <add>, %3, %cst_3 [0] : vector<8x128xf32> to vector<128xf32>
    %5 = vector.shape_cast %4 : vector<128xf32> to vector<1x128xf32>
    %cst_4 = arith.constant 1.250000e-01 : f32
    %6 = vector.broadcast %cst_4 : f32 to vector<1x128xf32>
    %7 = arith.mulf %5, %6 : vector<1x128xf32>
    %8 = arith.mulf %3, %3 : vector<8x128xf32>
    %cst_5 = arith.constant dense<0.000000e+00> : vector<128xf32>
    %9 = vector.multi_reduction <add>, %8, %cst_5 [0] : vector<8x128xf32> to vector<128xf32>
    %10 = vector.shape_cast %9 : vector<128xf32> to vector<1x128xf32>
    %cst_6 = arith.constant 1.250000e-01 : f32
    %11 = vector.broadcast %cst_6 : f32 to vector<1x128xf32>
    %12 = arith.mulf %10, %11 : vector<1x128xf32>
    %13 = arith.mulf %7, %7 : vector<1x128xf32>
    %14 = arith.subf %12, %13 : vector<1x128xf32>
    %cst_7 = arith.constant 0.000000e+00 : f32
    %15 = vector.broadcast %cst_7 : f32 to vector<1x128xf32>
    %16 = arith.maximumf %14, %15 : vector<1x128xf32>
    %c0_8 = arith.constant 0 : index
    %c0_9 = arith.constant 0 : index
    %17 = vector.load %arg3[%c0_8, %c0_9] : memref<1x128xf32, #tpu.memory_space<vmem>>, vector<1x128xf32>
    %cst_10 = arith.constant 9.99999974E-6 : f32
    %18 = vector.broadcast %cst_10 : f32 to vector<1x128xf32>
    %19 = arith.addf %16, %18 : vector<1x128xf32>
    %20 = math.rsqrt %19 : vector<1x128xf32>
    %21 = arith.mulf %17, %20 : vector<1x128xf32>
    %c0_11 = arith.constant 0 : index
    %c0_12 = arith.constant 0 : index
    %22 = vector.load %arg4[%c0_11, %c0_12] : memref<1x128xf32, #tpu.memory_space<vmem>>, vector<1x128xf32>
    %23 = arith.mulf %7, %21 : vector<1x128xf32>
    %24 = arith.subf %22, %23 : vector<1x128xf32>
    %25 = vector.broadcast %21 : vector<1x128xf32> to vector<8x128xf32>
    %26 = arith.mulf %3, %25 : vector<8x128xf32>
    %27 = vector.broadcast %24 : vector<1x128xf32> to vector<8x128xf32>
    %28 = arith.addf %26, %27 : vector<8x128xf32>
    %cst_13 = arith.constant 0.000000e+00 : f32
    %29 = vector.broadcast %cst_13 : f32 to vector<8x128xf32>
    %30 = arith.maximumf %28, %29 : vector<8x128xf32>
    %31 = arith.truncf %30 : vector<8x128xf32> to vector<8x128xbf16>
    %c0_14 = arith.constant 0 : index
    %c0_15 = arith.constant 0 : index
    %32 = vector.load %arg5[%c0_14, %c0_15] : memref<128x128xbf16, #tpu.memory_space<vmem>>, vector<128x128xbf16>
    %cst_16 = arith.constant dense<0.000000e+00> : vector<8x128xf32>
    %33 = tpu.matmul %31, %32, %cst_16 {dimension_numbers = #tpu.dot_dimension_numbers<[1], [0], [0], [1], [0, 0, 1, 1], [], []>} : vector<8x128xbf16>, vector<128x128xbf16>, vector<8x128xf32> -> vector<8x128xf32>
    %cst_17 = arith.constant dense<0.000000e+00> : vector<128xf32>
    %34 = vector.multi_reduction <add>, %33, %cst_17 [0] : vector<8x128xf32> to vector<128xf32>
    %35 = vector.shape_cast %34 : vector<128xf32> to vector<1x128xf32>
    %cst_18 = arith.constant 1.250000e-01 : f32
    %36 = vector.broadcast %cst_18 : f32 to vector<1x128xf32>
    %37 = arith.mulf %35, %36 : vector<1x128xf32>
    %38 = arith.mulf %33, %33 : vector<8x128xf32>
    %cst_19 = arith.constant dense<0.000000e+00> : vector<128xf32>
    %39 = vector.multi_reduction <add>, %38, %cst_19 [0] : vector<8x128xf32> to vector<128xf32>
    %40 = vector.shape_cast %39 : vector<128xf32> to vector<1x128xf32>
    %cst_20 = arith.constant 1.250000e-01 : f32
    %41 = vector.broadcast %cst_20 : f32 to vector<1x128xf32>
    %42 = arith.mulf %40, %41 : vector<1x128xf32>
    %43 = arith.mulf %37, %37 : vector<1x128xf32>
    %44 = arith.subf %42, %43 : vector<1x128xf32>
    %cst_21 = arith.constant 0.000000e+00 : f32
    %45 = vector.broadcast %cst_21 : f32 to vector<1x128xf32>
    %46 = arith.maximumf %44, %45 : vector<1x128xf32>
    %c0_22 = arith.constant 0 : index
    %c0_23 = arith.constant 0 : index
    %47 = vector.load %arg6[%c0_22, %c0_23] : memref<1x128xf32, #tpu.memory_space<vmem>>, vector<1x128xf32>
    %cst_24 = arith.constant 9.99999974E-6 : f32
    %48 = vector.broadcast %cst_24 : f32 to vector<1x128xf32>
    %49 = arith.addf %46, %48 : vector<1x128xf32>
    %50 = math.rsqrt %49 : vector<1x128xf32>
    %51 = arith.mulf %47, %50 : vector<1x128xf32>
    %c0_25 = arith.constant 0 : index
    %c0_26 = arith.constant 0 : index
    %52 = vector.load %arg7[%c0_25, %c0_26] : memref<1x128xf32, #tpu.memory_space<vmem>>, vector<1x128xf32>
    %53 = arith.mulf %37, %51 : vector<1x128xf32>
    %54 = arith.subf %52, %53 : vector<1x128xf32>
    %55 = vector.broadcast %51 : vector<1x128xf32> to vector<8x128xf32>
    %56 = arith.mulf %33, %55 : vector<8x128xf32>
    %57 = vector.broadcast %54 : vector<1x128xf32> to vector<8x128xf32>
    %58 = arith.addf %56, %57 : vector<8x128xf32>
    %cst_27 = arith.constant 0.000000e+00 : f32
    %59 = vector.broadcast %cst_27 : f32 to vector<8x128xf32>
    %60 = arith.maximumf %58, %59 : vector<8x128xf32>
    %c0_28 = arith.constant 0 : index
    %c0_29 = arith.constant 0 : index
    %61 = vector.load %arg8[%c0_28, %c0_29] : memref<8x128xf32, #tpu.memory_space<vmem>>, vector<8x128xf32>
    tpu.vector_store %arg8[%c0_28, %c0_29], %60 {strides = array<i32>} : memref<8x128xf32, #tpu.memory_space<vmem>>, vector<8x128xf32>,
    return
  }
  func.func @transform_0(%arg0: i32) -> (i32, i32) {
    %c0_i32 = arith.constant 0 : i32
    %c0_i32_0 = arith.constant 0 : i32
    %c0_i32_1 = arith.constant 0 : i32
    return %c0_i32, %c0_i32_0 : i32, i32
  }
  func.func @transform_1(%arg0: i32) -> (i32, i32) {
    %c0_i32 = arith.constant 0 : i32
    %c0_i32_0 = arith.constant 0 : i32
    %c0_i32_1 = arith.constant 0 : i32
    return %c0_i32, %c0_i32_0 : i32, i32
  }
  func.func @transform_2(%arg0: i32) -> (i32, i32) {
    %c0_i32 = arith.constant 0 : i32
    %c0_i32_0 = arith.constant 0 : i32
    %c0_i32_1 = arith.constant 0 : i32
    return %c0_i32, %c0_i32_0 : i32, i32
  }
  func.func @transform_3(%arg0: i32) -> (i32, i32) {
    %c0_i32 = arith.constant 0 : i32
    %c0_i32_0 = arith.constant 0 : i32
    %c0_i32_1 = arith.constant 0 : i32
    return %c0_i32, %c0_i32_0 : i32, i32
  }
  func.func @transform_4(%arg0: i32) -> (i32, i32) {
    %c0_i32 = arith.constant 0 : i32
    %c0_i32_0 = arith.constant 0 : i32
    %c0_i32_1 = arith.constant 0 : i32
    return %c0_i32, %c0_i32_0 : i32, i32
  }
  func.func @transform_5(%arg0: i32) -> (i32, i32) {
    %c0_i32 = arith.constant 0 : i32
    %c0_i32_0 = arith.constant 0 : i32
    %c0_i32_1 = arith.constant 0 : i32
    return %c0_i32, %c0_i32_0 : i32, i32
  }
  func.func @transform_6(%arg0: i32) -> (i32, i32) {
    %c0_i32 = arith.constant 0 : i32
    %c0_i32_0 = arith.constant 0 : i32
    %c0_i32_1 = arith.constant 0 : i32
    return %c0_i32, %c0_i32_0 : i32, i32
  }
  func.func @transform_7(%arg0: i32) -> (i32, i32) {
    %c0_i32 = arith.constant 0 : i32
    %c0_i32_0 = arith.constant 0 : i32
    %c0_i32_1 = arith.constant 0 : i32
    return %c0_i32, %c0_i32_0 : i32, i32
  }
}

</mosaic_0001>

<bundles_post_ra>
// kernel: tpu_custom_call.1
= control target key start
LH: loop header
LB: loop body
LE: loop exit
PB: predicated region body
PF: predicated region fallthrough
CT: control target
= control target key end

     0   :  { %12 = vsyncpa [#allocation3], 0  ;;  %s596_s0 = inlined_call_operand.hbm [shape: f32[8,128], index: 0, kind: input, shape index: {}]   ;;  %s597_s1 = inlined_call_operand.hbm [shape: bf16[128,128], index: 1, kind: input, shape index: {}]   ;;  %s598_s2 = inlined_call_operand.vmem [shape: f32[1,128], index: 2, kind: input, shape index: {}]   ;;  %s599_s3 = inlined_call_operand.vmem [shape: f32[1,128], index: 3, kind: input, shape index: {}]   ;;  %s600_s4 = inlined_call_operand.hbm [shape: bf16[128,128], index: 4, kind: input, shape index: {}]   ;;  %s601_s5 = inlined_call_operand.vmem [shape: f32[1,128], index: 5, kind: input, shape index: {}]   ;;  %s602_s6 = inlined_call_operand.vmem [shape: f32[1,128], index: 6, kind: input, shape index: {}]   ;;  %s603_s7 = inlined_call_operand.hbm [shape: f32[8,128], index: 7, kind: output, shape index: {}]  }
   0x1   :  { %13 = vsyncpa [#allocation6], 0  ;;  %s30_s26 = sshll.u32 %s597_s1, 4  ;;  %s31_s26 = int_to_ptr.hbm [resolvable:$true] %s30_s26 }
   0x2   :  { %14 = vsyncpa [#allocation4], 0  ;;  %s526_s27 = smov [#allocation5]   ;;  %s20_s8 = sshll.u32 %s596_s0, 4  ;;  %s21_s8 = int_to_ptr.hbm [resolvable:$true] %s20_s8 }
   0x3   :  { %s32_s28 = sshll.u32 %s526_s27, 4  ;;  %s527_s9 = smov 64   ;;  %s33_s28 = int_to_ptr.vmem [resolvable:$true] %s32_s28 }
   0x4   :  { %s528_s10 = smov 4   ;;  %s529_s11 = smov [#allocation2]  }
   0x5   :  { %38 = dma.hbm_to_vmem [thread:$0]  %s31_s26, 1024, %s33_s28, [#allocation6], %s527_s9, %s527_s9, %s528_s10  }
   0x6   :  { %s22_s12 = sshll.u32 %s529_s11, 4  ;;  %s47_s15 = sshll.u32 %s600_s4, 4  ;;  %s23_s12 = int_to_ptr.vmem [resolvable:$true] %s22_s12  ;;  %s48_s15 = int_to_ptr.hbm [resolvable:$true] %s47_s15 }
   0x7   :  { %25 = dma.hbm_to_vmem [thread:$0]  %s21_s8, 128, %s23_s12, [#allocation3]  }
   0x8   :  { %s530_s1 = smov [#allocation7]  }
   0x9   :  { %s49_s16 = sshll.u32 %s530_s1, 4  ;;  %s50_s16 = int_to_ptr.vmem [resolvable:$true] %s49_s16 }
   0xa   :  { %55 = dma.hbm_to_vmem [thread:$0]  %s48_s15, 1024, %s50_s16, [#allocation6], %s527_s9, %s527_s9, %s528_s10  }
   0xb   :  { %520 = dma.done.wait [#allocation3], 128  }
   0xc   :  { %521 = vsyncadd [#allocation3], 4294967168 }
   0xd   :  { %522 = dma.done.wait [#allocation6], 2048  }
   0xe   :  { %523 = vsyncadd [#allocation6], 4294965248  ;;  %v405_v0 = vld [vmem:[#allocation5 + $0x38] sm:$0xff]  ;;  %v404_v1 = vld [vmem:[#allocation5 + $0x30] sm:$0xff]  ;;  %s531_s21 = smov [#allocation8]  }
   0xf   :  { %138 = vmatpush.bf16.msra.mxu0 %v405_v0  ;;  %v403_v2 = vld [vmem:[#allocation5 + $0x28] sm:$0xff]  ;;  %v402_v3 = vld [vmem:[#allocation5 + $0x20] sm:$0xff]  ;;  %v401_v4 = vld [vmem:[#allocation5 + $0x18] sm:$0xff]  ;;  %s321_s22 = sshll.u32 %s531_s21, 4  ;;  %s322_s22 = int_to_ptr.vmem [resolvable:$true] %s321_s22 }
  0x10   :  { %v400_v5 = vld [vmem:[#allocation5 + $0x10] sm:$0xff]  ;;  %v399_v6 = vld [vmem:[#allocation5 + $0x8] sm:$0xff]  ;;  %v398_v7 = vld [vmem:[#allocation5] sm:$0xff] }
  0x11   :  { %v72_v8 = vld [vmem:[#allocation2] sm:$0xff]  ;;  %v412_v11 = vld [vmem:[#allocation7 + $0x30] sm:$0xff]  ;;  %v411_v12 = vld [vmem:[#allocation7 + $0x28] sm:$0xff] }
  0x12   :  { %v73_v9 = vpack.c.bf16 %v72_v8, %v72_v8  ;;  %v413_v10 = vld [vmem:[#allocation7 + $0x38] sm:$0xff]  ;;  %v410_v13 = vld [vmem:[#allocation7 + $0x20] sm:$0xff]  ;;  %v408_v18 = vld [vmem:[#allocation7 + $0x10] sm:$0xff] }
  0x13   :  { %139 = vmatpush.bf16.msra.mxu0 %v404_v1  ;;  %259 = vmatpush.bf16.msra.mxu1 %v413_v10  ;;  %v409_v14 = vld [vmem:[#allocation7 + $0x18] sm:$0xff]  ;;  %v407_v23 = vld [vmem:[#allocation7 + $0x8] sm:$0xff]  ;;  %v406_v29 = vld [vmem:[#allocation7] sm:$0xff] }
  0x14   :  { %v169_v44 = vld [vmem:[%s598_s2] sm:$0x1] }
  0x15   :  { %v182_v48 = vld [vmem:[%s599_s3] sm:$0x1] }
  0x17   :  { %140 = vmatpush.bf16.msra.mxu0 %v403_v2  ;;  %260 = vmatpush.bf16.msra.mxu1 %v412_v11 }
  0x1b   :  { %141 = vmatpush.bf16.msra.mxu0 %v402_v3  ;;  %261 = vmatpush.bf16.msra.mxu1 %v411_v12 }
  0x1f   :  { %142 = vmatpush.bf16.msra.mxu0 %v401_v4  ;;  %262 = vmatpush.bf16.msra.mxu1 %v410_v13 }
  0x23   :  { %143 = vmatpush.bf16.msra.mxu0 %v400_v5  ;;  %263 = vmatpush.bf16.msra.mxu1 %v409_v14 }
  0x27   :  { %144 = vmatpush.bf16.msra.mxu0 %v399_v6  ;;  %264 = vmatpush.bf16.msra.mxu1 %v408_v18 }
  0x2b   :  { %145 = vmatpush.bf16.msra.mxu0 %v398_v7  ;;  %265 = vmatpush.bf16.msra.mxu1 %v407_v23  ;;  %v303_v23 = vld [vmem:[%s602_s6] sm:$0x1] }
  0x2e   :  { %146 = vmatmul.bf16.vlgmr.msra.gmra.mxu0 %v73_v9 }
  0x2f   :  { %266 = vmatpush.bf16.msra.mxu1 %v406_v29 }
  0xab   :  { %v147_v15 = vpop.f32.mrf.mxu0 }
  0xac   :  { %v151_v16 = vrot.slane %v147_v15, 4  ;;  %v158_v17 = vmul.f32 %v147_v15, %v147_v15 }
  0xae   :  { %v152_v19 = vadd.f32 %v151_v16, %v147_v15  ;;  %v159_v20 = vrot.slane %v158_v17, 4 }
  0xb0   :  { %v153_v21 = vrot.slane %v152_v19, 2  ;;  %v160_v22 = vadd.f32 %v159_v20, %v158_v17 }
  0xb2   :  { %v154_v24 = vadd.f32 %v153_v21, %v152_v19  ;;  %v161_v25 = vrot.slane %v160_v22, 2  ;;  %v290_v19 = vld [vmem:[%s601_s5] sm:$0x1]  ;;  %s323_s5 = sshll.u32 %s603_s7, 4  ;;  %s324_s5 = int_to_ptr.hbm [resolvable:$true] %s323_s5 }
  0xb3   :  { %v149_v26 = vpop.f32.mrf.mxu0 }
  0xb4   :  { %v155_v27 = vrot.slane %v154_v24, 1  ;;  %v162_v28 = vadd.f32 %v161_v25, %v160_v22 }
  0xb6   :  { %v163_v30 = vrot.slane %v162_v28, 1  ;;  %v156_v31 = vadd.f32 %v155_v27, %v154_v24 }
  0xb8   :  { %v164_v32 = vadd.f32 %v163_v30, %v162_v28  ;;  %v157_v33 = vmul.f32 0.125, %v156_v31 }
  0xba   :  { %v165_v34 = vmul.f32 0.125, %v164_v32  ;;  %v166_v35 = vmul.f32 %v157_v33, %v157_v33 }
  0xbc   :  { %v167_v36 = vsub.f32 %v165_v34, %v166_v35 }
  0xbe   :  { %v168_v37 = vmax.f32 %v167_v36, 0.0 }
  0xc0   :  { %v170_v38 = vadd.f32 1e-05, %v168_v37 }
  0xc2   :  { %420 = vrsqrt.f32 %v170_v38  ;;  %vm177_vm1 = vweird.f32 %v170_v38 }
  0xc8   :  { %v421_v39 = vpop.eup %420 }
  0xc9   :  { %v172_v40 = vmul.f32 %v421_v39, %v170_v38  ;;  %vm178_vm0 = vweird.f32 %v421_v39 }
  0xca   :  { %vm179_vm2 = vmor %vm177_vm1, %vm178_vm0 }
  0xcb   :  { %v173_v41 = vmul.f32 %v421_v39, %v172_v40 }
  0xcd   :  { %v174_v42 = vmul.f32 0.5, %v173_v41 }
  0xcf   :  { %v175_v43 = vsub.f32 1.5, %v174_v42 }
  0xd1   :  { %v176_v45 = vmul.f32 %v421_v39, %v175_v43 }
  0xd3   :  { %v180_v46 = vsel %vm179_vm2, %v421_v39, %v176_v45 }
  0xd4   :  { %v181_v47 = vmul.f32 %v180_v46, %v169_v44 }
  0xd6   :  { %v183_v49 = vmul.f32 %v181_v47, %v157_v33  ;;  %v186_v50 = vperm.slane %v181_v47, 0 }
  0xd8   :  { %v184_v51 = vsub.f32 %v182_v48, %v183_v49  ;;  %v188_v52 = vmul.f32 %v186_v50, %v147_v15 }
  0xda   :  { %v190_v53 = vperm.slane %v184_v51, 0 }
  0xdc   :  { %v192_v54 = vadd.f32 %v190_v53, %v188_v52 }
  0xde   :  { %v193_v55 = vmax.f32 %v192_v54, 0.0 }
  0xe0   :  { %v194_v56 = vpack.c.bf16 %v193_v55, %v193_v55 }
  0xe2   :  { %267 = vmatmul.bf16.vlgmr.msra.gmra.mxu1 %v194_v56 }
 0x15f   :  { %v268_v57 = vpop.f32.mrf.mxu1 }
 0x160   :  { %v272_v58 = vrot.slane %v268_v57, 4  ;;  %v279_v59 = vmul.f32 %v268_v57, %v268_v57 }
 0x162   :  { %v273_v60 = vadd.f32 %v272_v58, %v268_v57  ;;  %v280_v61 = vrot.slane %v279_v59, 4 }
 0x164   :  { %v274_v62 = vrot.slane %v273_v60, 2  ;;  %v281_v63 = vadd.f32 %v280_v61, %v279_v59 }
 0x166   :  { %v275_v0 = vadd.f32 %v274_v62, %v273_v60  ;;  %v282_v1 = vrot.slane %v281_v63, 2 }
 0x167   :  { %v270_v2 = vpop.f32.mrf.mxu1 }
 0x168   :  { %v276_v3 = vrot.slane %v275_v0, 1  ;;  %v283_v4 = vadd.f32 %v282_v1, %v281_v63 }
 0x16a   :  { %v277_v5 = vadd.f32 %v276_v3, %v275_v0  ;;  %v284_v6 = vrot.slane %v283_v4, 1 }
 0x16c   :  { %v278_v7 = vmul.f32 0.125, %v277_v5  ;;  %v285_v8 = vadd.f32 %v284_v6, %v283_v4 }
 0x16e   :  { %v286_v9 = vmul.f32 0.125, %v285_v8  ;;  %v287_v10 = vmul.f32 %v278_v7, %v278_v7 }
 0x170   :  { %v288_v11 = vsub.f32 %v286_v9, %v287_v10 }
 0x172   :  { %v289_v12 = vmax.f32 %v288_v11, 0.0 }
 0x174   :  { %v291_v13 = vadd.f32 1e-05, %v289_v12 }
 0x176   :  { %422 = vrsqrt.f32 %v291_v13  ;;  %vm298_vm4 = vweird.f32 %v291_v13 }
 0x17c   :  { %v423_v14 = vpop.eup %422 }
 0x17d   :  { %v293_v15 = vmul.f32 %v423_v14, %v291_v13  ;;  %vm299_vm3 = vweird.f32 %v423_v14 }
 0x17e   :  { %vm300_vm5 = vmor %vm298_vm4, %vm299_vm3 }
 0x17f   :  { %v294_v16 = vmul.f32 %v423_v14, %v293_v15 }
 0x181   :  { %v295_v17 = vmul.f32 0.5, %v294_v16 }
 0x183   :  { %v296_v18 = vsub.f32 1.5, %v295_v17 }
 0x185   :  { %v297_v20 = vmul.f32 %v423_v14, %v296_v18 }
 0x187   :  { %v301_v21 = vsel %vm300_vm5, %v423_v14, %v297_v20 }
 0x188   :  { %v302_v22 = vmul.f32 %v301_v21, %v290_v19 }
 0x18a   :  { %v307_v24 = vperm.slane %v302_v22, 0  ;;  %v304_v25 = vmul.f32 %v302_v22, %v278_v7 }
 0x18c   :  { %v305_v26 = vsub.f32 %v303_v23, %v304_v25  ;;  %v309_v27 = vmul.f32 %v307_v24, %v268_v57 }
 0x18e   :  { %v311_v28 = vperm.slane %v305_v26, 0 }
 0x190   :  { %v313_v29 = vadd.f32 %v311_v28, %v309_v27 }
 0x192   :  { %v314_v30 = vmax.f32 %v313_v29, 0.0 }
 0x194   :  { %315 = vst [vmem:[#allocation8] sm:$0xff] %v314_v30 }
 0x195   :  { %326 = dma.vmem_to_hbm [thread:$0]  %s322_s22, 128, %s324_s5, [#allocation4]  }
 0x196   :  { %524 = dma.done.wait [#allocation4], 128  }
 0x197   :  { %525 = vsyncadd [#allocation4], 4294967168 }
 0x198   :  { %331 = vsyncpa [#allocation3], 1 }
 0x199   :  { %332 = vsyncpa [#allocation6], 1 }
 0x19a   :  { %333 = vsyncpa [#allocation4], 1 }

</bundles_post_ra>
